<compile_context>
chip_gen: v7x
topology: tpu7x:2x2x1
jax: 0.10.0
libtpu: 0.0.40
codegen_flags: <defaults>
</compile_context>

<pallas_src>
import jax
import jax.numpy as jnp
from jax.experimental import pallas as pl
from jax.experimental.pallas import tpu as pltpu

IN_F, HID_F, OUT_F = 4, 10, 3      # logical MLP dims (PyTorch module)
SUBLANE = 8                        # TPU sublane granularity
SMALL_B = 512                      # cutoff for the grid-less path
DEFAULT_TILE_B = 4096              # batch tile for the gridded path


def mlp_kernel(x_ref, w1_ref, b1_ref, w2_ref, b2_ref, o_ref):
    """Fused MLP on one VMEM tile: relu(x@W1+b1)@W2+b2 (logical widths)."""
    x = x_ref[...]                                           # (Bt, 4)
    h = jnp.dot(x, w1_ref[...],
                preferred_element_type=jnp.float32) + b1_ref[...]
    h = jnp.maximum(h, 0.0)                                  # ReLU, (Bt, 10)
    y = jnp.dot(h, w2_ref[...],
                preferred_element_type=jnp.float32) + b2_ref[...]
    o_ref[...] = y.astype(o_ref.dtype)                       # (Bt, 3)


def _round_up(n, m):
    return (n + m - 1) // m * m


@jax.jit
def mlp_forward(x, w1, b1, w2, b2):
    """Forward pass matching the PyTorch module; x is (B, 4) float32."""
    B = x.shape[0]

    if B <= SMALL_B:
        # Small batch: single VMEM tile, no grid -> no per-step pipeline cost.
        Bp = _round_up(max(B, 1), SUBLANE)
        xp = x if Bp == B else jnp.pad(x, ((0, Bp - B), (0, 0)))
        out = pl.pallas_call(
            mlp_kernel,
            out_shape=jax.ShapeDtypeStruct((Bp, OUT_F), x.dtype),
            in_specs=[pl.BlockSpec(memory_space=pltpu.MemorySpace.VMEM)] * 5,
            out_specs=pl.BlockSpec(memory_space=pltpu.MemorySpace.VMEM),
        )(xp, w1, b1, w2, b2)
    else:
        # Large batch: tile over batch, weights/biases resident & replicated.
        # Ensure >= 2 grid steps so v7x can shard over both TensorCores.
        tile_b = min(DEFAULT_TILE_B, _round_up(-(-B // 2), SUBLANE))
        Bp = _round_up(B, tile_b)
        xp = x if Bp == B else jnp.pad(x, ((0, Bp - B), (0, 0)))
        out = pl.pallas_call(
            mlp_kernel,
            out_shape=jax.ShapeDtypeStruct((Bp, OUT_F), x.dtype),
            grid=(Bp // tile_b,),
            in_specs=[
                pl.BlockSpec((tile_b, IN_F), lambda i: (i, 0)),
                pl.BlockSpec((IN_F, HID_F), lambda i: (0, 0)),
                pl.BlockSpec((1, HID_F), lambda i: (0, 0)),
                pl.BlockSpec((HID_F, OUT_F), lambda i: (0, 0)),
                pl.BlockSpec((1, OUT_F), lambda i: (0, 0)),
            ],
            out_specs=pl.BlockSpec((tile_b, OUT_F), lambda i: (i, 0)),
            compiler_params=pltpu.CompilerParams(
                dimension_semantics=("parallel",)),
        )(xp, w1, b1, w2, b2)

    # Only the batch axis was padded; slice it back to the logical size.
    return out[:B]


def init_params(key):
    """Deterministic init mimicking PyTorch nn.Linear default
    (uniform in [-1/sqrt(fan_in), 1/sqrt(fan_in)]); stored as (in, out)."""
    k1, k2, k3, k4 = jax.random.split(key, 4)
    bound1 = 1.0 / jnp.sqrt(IN_F)
    bound2 = 1.0 / jnp.sqrt(HID_F)
    w1 = jax.random.uniform(k1, (IN_F, HID_F), jnp.float32, -bound1, bound1)
    b1 = jax.random.uniform(k2, (1, HID_F), jnp.float32, -bound1, bound1)
    w2 = jax.random.uniform(k3, (HID_F, OUT_F), jnp.float32, -bound2, bound2)
    b2 = jax.random.uniform(k4, (1, OUT_F), jnp.float32, -bound2, bound2)
    return w1, b1, w2, b2


def reference_forward(x, w1, b1, w2, b2):
    h = jnp.maximum(x @ w1 + b1, 0.0)
    return h @ w2 + b2


if __name__ == "__main__":
    key = jax.random.PRNGKey(0)
    k_x, k_x2, k_p = jax.random.split(key, 3)
    w1, b1, w2, b2 = init_params(k_p)

    # Small batch -> no-grid single-tile path.
    batch = 8
    x = jax.random.normal(k_x, (batch, IN_F), jnp.float32)
    out = jax.block_until_ready(mlp_forward(x, w1, b1, w2, b2))
    ref = reference_forward(x, w1, b1, w2, b2)
    assert out.shape == (batch, OUT_F)
    assert jnp.allclose(out, ref, atol=1e-5, rtol=1e-5)

    # Larger batch -> batch-tiled ("parallel") grid path (>= 2 steps),
    # including a ragged batch tail that gets padded and sliced off.
    big_batch = 600
    xb = jax.random.normal(k_x2, (big_batch, IN_F), jnp.float32)
    out_b = jax.block_until_ready(mlp_forward(xb, w1, b1, w2, b2))
    ref_b = reference_forward(xb, w1, b1, w2, b2)
    assert out_b.shape == (big_batch, OUT_F)
    assert jnp.allclose(out_b, ref_b, atol=1e-5, rtol=1e-5)

    print("KERNEL_OK")
</pallas_src>

<mosaic_0001>
module attributes {stable_mosaic.version = 11 : i64} {
  func.func @mlp_kernel(%arg0: memref<8x4xf32, #tpu.memory_space<vmem>>, %arg1: memref<4x10xf32, #tpu.memory_space<vmem>>, %arg2: memref<1x10xf32, #tpu.memory_space<vmem>>, %arg3: memref<10x3xf32, #tpu.memory_space<vmem>>, %arg4: memref<1x3xf32, #tpu.memory_space<vmem>>, %arg5: memref<8x3xf32, #tpu.memory_space<vmem>>) attributes {dimension_semantics = [], scalar_prefetch = 0 : i64, scratch_operands = 0 : i64, tpu.core_type = #tpu.core_type<tc>} {
    %c0 = arith.constant 0 : index
    %c0_0 = arith.constant 0 : index
    %0 = vector.load %arg0[%c0, %c0_0] : memref<8x4xf32, #tpu.memory_space<vmem>>, vector<8x4xf32>
    %c0_1 = arith.constant 0 : index
    %c0_2 = arith.constant 0 : index
    %1 = vector.load %arg1[%c0_1, %c0_2] : memref<4x10xf32, #tpu.memory_space<vmem>>, vector<4x10xf32>
    %cst = arith.constant dense<0.000000e+00> : vector<8x10xf32>
    %2 = tpu.matmul %0, %1, %cst {dimension_numbers = #tpu.dot_dimension_numbers<[1], [0], [0], [1], [0, 0, 1, 1], [], []>} : vector<8x4xf32>, vector<4x10xf32>, vector<8x10xf32> -> vector<8x10xf32>
    %c0_3 = arith.constant 0 : index
    %c0_4 = arith.constant 0 : index
    %3 = vector.load %arg2[%c0_3, %c0_4] : memref<1x10xf32, #tpu.memory_space<vmem>>, vector<1x10xf32>
    %4 = vector.broadcast %3 : vector<1x10xf32> to vector<8x10xf32>
    %5 = arith.addf %2, %4 : vector<8x10xf32>
    %cst_5 = arith.constant 0.000000e+00 : f32
    %6 = vector.broadcast %cst_5 : f32 to vector<8x10xf32>
    %7 = arith.maximumf %5, %6 : vector<8x10xf32>
    %c0_6 = arith.constant 0 : index
    %c0_7 = arith.constant 0 : index
    %8 = vector.load %arg3[%c0_6, %c0_7] : memref<10x3xf32, #tpu.memory_space<vmem>>, vector<10x3xf32>
    %cst_8 = arith.constant dense<0.000000e+00> : vector<8x3xf32>
    %9 = tpu.matmul %7, %8, %cst_8 {dimension_numbers = #tpu.dot_dimension_numbers<[1], [0], [0], [1], [0, 0, 1, 1], [], []>} : vector<8x10xf32>, vector<10x3xf32>, vector<8x3xf32> -> vector<8x3xf32>
    %c0_9 = arith.constant 0 : index
    %c0_10 = arith.constant 0 : index
    %10 = vector.load %arg4[%c0_9, %c0_10] : memref<1x3xf32, #tpu.memory_space<vmem>>, vector<1x3xf32>
    %11 = vector.broadcast %10 : vector<1x3xf32> to vector<8x3xf32>
    %12 = arith.addf %9, %11 : vector<8x3xf32>
    %c0_11 = arith.constant 0 : index
    %c0_12 = arith.constant 0 : index
    %13 = vector.load %arg5[%c0_11, %c0_12] : memref<8x3xf32, #tpu.memory_space<vmem>>, vector<8x3xf32>
    tpu.vector_store %arg5[%c0_11, %c0_12], %12 {strides = array<i32>} : memref<8x3xf32, #tpu.memory_space<vmem>>, vector<8x3xf32>,
    return
  }
}

</mosaic_0001>

<bundles_post_ra>
// kernel: mlp_forward.1
= control target key start
LH: loop header
LB: loop body
LE: loop exit
PB: predicated region body
PF: predicated region fallthrough
CT: control target
= control target key end

     0   :  { %vm33_vm0 = vcmask 1043456   ;;  %vm29_vm1 = vcmask 31744   ;;  %v232_v0 = vmov 0.0   ;;  %vm233_vm2 = vmmov 0   ;;  %s287_s1 = inlined_call_operand.vmem [shape: f32[4,10], index: 1, kind: input, shape index: {}]   ;;  %s288_s0 = inlined_call_operand.vmem [shape: f32[8,4], index: 0, kind: input, shape index: {}]   ;;  %s289_s3 = inlined_call_operand.vmem [shape: f32[10,3], index: 3, kind: input, shape index: {}]   ;;  %s290_s2 = inlined_call_operand.vmem [shape: f32[1,10], index: 2, kind: input, shape index: {}]   ;;  %s291_s4 = inlined_call_operand.vmem [shape: f32[1,3], index: 4, kind: input, shape index: {}]   ;;  %s292_s5 = inlined_call_operand.vmem [shape: f32[8,3], index: 5, kind: output, shape index: {}]  }
   0x1   :  { %212 = vmatprep.subr.mxu0 %v232_v0  ;;  %v21_v1 = vld [vmem:[%s287_s1] sm:$0xf]  ;;  %214 = vmatprep.mubr.msk.f32.mxu0 %vm233_vm2, %v232_v0  ;;  %v109_v4 = vld [vmem:[%s289_s3 + $0x8] sm:$0x3]  ;;  %vm121_vm3 = vcmask 1041408   ;;  %v234_v6 = vmov 0.0|0.0  }
   0x2   :  { %v20_v2 = vld [vmem:[%s288_s0] sm:$0xff]  ;;  %213 = vmatpush3.msk.msra.mxu0 %vm33_vm0, %v21_v1  ;;  %221 = vmatprep.mubr.msk.f32.mxu1 %vm233_vm2, %v232_v0  ;;  %vm235_vm4 = vmmov 1   ;;  %vm117_vm6 = vcmask 80896   ;;  %vm195_vm7 = vcmask 23552  }
   0x3   :  { %215 = vmatmul.mubr.msk.f32.vlgmr.msra.gmra.mrb[0].mxu0 %vm29_vm1, %v20_v2  ;;  %v108_v3 = vld [vmem:[%s289_s3] sm:$0xff]  ;;  %224 = vmatprep.subr.bf16.mxu1 %v234_v6  ;;  %vm226_vm5 = vmpackc.low %vm121_vm3, %vm235_vm4 }
   0x4   :  { %v225_v5 = vpack.c.bf16 %v109_v4, %v108_v3  ;;  %v201_v7 = vld [vmem:[%s290_s2] ss:$0 sm:$0xff] }
   0x5   :  { %v204_v12 = vld [vmem:[%s291_s4] ss:$0 sm:$0xff] }
   0x6   :  { %227 = vmatpush3.bf16.msk.msra.mxu1 %vm226_vm5, %v225_v5 }
  0xd6   :  { %v103_v8 = vpop.f32.mrb[0].mxu0 }
  0xd7   :  { %v104_v9 = vadd.f32 %v201_v7, %v103_v8  ;;  %v216_v10 = vpop.f32.mrb[1].mxu0 }
  0xd9   :  { %v107_v11 = vmax.f32 %v104_v9, 0.0 }
  0xdb   :  { %222 = vmatmul.mubr.msk.f32.vlgmr.msra.gmra.mrb[0].mxu1 %vm117_vm6, %v107_v11 }
 0x1ae   :  { %v191_v13 = vpop.f32.mrb[0].mxu1 }
 0x1af   :  { %v192_v14 = vadd.f32 %v204_v12, %v191_v13  ;;  %v223_v15 = vpop.f32.mrb[1].mxu1 }
 0x1b1   :  { %196 = vst.msk [vmem:[%s292_s5] sm:$0xff] %vm195_vm7, %v192_v14 }

</bundles_post_ra>
